<compile_context>
chip_gen: v7x
topology: tpu7x:2x2x1
jax: 0.10.0
libtpu: 0.0.40
codegen_flags: <defaults>
</compile_context>

<pallas_src>
import numpy as np
import jax
import jax.numpy as jnp
from jax.experimental import pallas as pl
from jax.experimental.pallas import tpu as pltpu


def gkern(kernlen=3, std=2.0):
    """2D Gaussian kernel, matching scipy.signal.gaussian(kernlen, std) outer product."""
    n = np.arange(kernlen, dtype=np.float64) - (kernlen - 1) / 2.0
    g1d = np.exp(-0.5 * (n / std) ** 2)
    return np.outer(g1d, g1d).astype(np.float32)


def _gkern1d(kernlen=3, std=2.0):
    """1D Gaussian (the separable factor: gkern = outer(g1d, g1d))."""
    n = np.arange(kernlen, dtype=np.float64) - (kernlen - 1) / 2.0
    return np.exp(-0.5 * (n / std) ** 2).astype(np.float32)


def _round_up(v, m):
    return ((v + m - 1) // m) * m


def _vmem_capacity_bytes():
    """Physical VMEM per core; conservative 64 MiB fallback (safe on every generation)."""
    try:
        return int(pltpu.get_tpu_info().vmem_capacity_bytes)
    except Exception:
        return 64 * 1024 * 1024


def _num_tensorcores():
    """2 TensorCores per chip on v7x, 1 on v5e/v6e (best-effort detection)."""
    try:
        kind = (getattr(jax.devices()[0], "device_kind", "") or "").lower()
        if "v7" in kind:
            return 2
    except Exception:
        pass
    return 1


def _make_reg_kernel(B, H, W, K, dilation, pad, g1d, bias):
    """Small-tile path: padded input + horizontal result live as values (no VMEM scratch)."""

    def kernel(x_ref, o_ref):
        xv = x_ref[...].astype(jnp.float32)                      # (B, H, W)
        if pad > 0:
            zc = jnp.zeros((B, H, pad), jnp.float32)
            xpad = jnp.concatenate([zc, xv, zc], axis=2)         # (B, H, Wp)
        else:
            xpad = xv

        # Horizontal 1-D pass: K taps along lanes (W), accumulator seeded with first term.
        acc_h = jnp.float32(g1d[0]) * xpad[:, :, 0:W]
        for j in range(1, K):
            acc_h = acc_h + jnp.float32(g1d[j]) * xpad[:, :, j * dilation:j * dilation + W]

        if pad > 0:
            zr = jnp.zeros((B, pad, W), jnp.float32)
            hpad = jnp.concatenate([zr, acc_h, zr], axis=1)      # (B, Hp, W)
        else:
            hpad = acc_h

        # Vertical 1-D pass: K taps along sublanes (H), then bias.
        acc_v = jnp.float32(g1d[0]) * hpad[:, 0:H, :]
        for i in range(1, K):
            acc_v = acc_v + jnp.float32(g1d[i]) * hpad[:, i * dilation:i * dilation + H, :]
        o_ref[...] = (acc_v + jnp.float32(bias)).astype(o_ref.dtype)

    return kernel


def _make_scratch_kernel(B, H, W, K, dilation, pad, g1d, bias):
    """Large-tile path: W-padded input scratch + H-padded intermediate scratch in VMEM.

    Only the halo strips are zeroed each step (not full tiles); re-zeroed every step
    because scratch is per-core persistent when the batch axis is 'parallel'.
    """

    def kernel(x_ref, o_ref, xp_ref, tmp_ref):
        # xp_ref: (B, H, Wp) — zero only the left/right pad columns, then copy the data.
        if pad > 0:
            xp_ref[:, :, pl.ds(0, pad)] = jnp.zeros((B, H, pad), jnp.float32)
            xp_ref[:, :, pl.ds(pad + W, pad)] = jnp.zeros((B, H, pad), jnp.float32)
        xp_ref[:, :, pl.ds(pad, W)] = x_ref[...].astype(jnp.float32)

        # Horizontal 1-D pass (taps along lanes).
        acc_h = jnp.float32(g1d[0]) * xp_ref[:, :, pl.ds(0, W)]
        for j in range(1, K):
            acc_h = acc_h + jnp.float32(g1d[j]) * xp_ref[:, :, pl.ds(j * dilation, W)]

        # tmp_ref: (B, Hp, W) — zero only the top/bottom pad rows, then store the interior.
        if pad > 0:
            tmp_ref[:, pl.ds(0, pad), :] = jnp.zeros((B, pad, W), jnp.float32)
            tmp_ref[:, pl.ds(pad + H, pad), :] = jnp.zeros((B, pad, W), jnp.float32)
        tmp_ref[:, pl.ds(pad, H), :] = acc_h

        # Vertical 1-D pass (taps along sublanes), then bias.
        acc_v = jnp.float32(g1d[0]) * tmp_ref[:, pl.ds(0, H), :]
        for i in range(1, K):
            acc_v = acc_v + jnp.float32(g1d[i]) * tmp_ref[:, pl.ds(i * dilation, H), :]
        o_ref[...] = (acc_v + jnp.float32(bias)).astype(o_ref.dtype)

    return kernel


def _choose_batch_tile(N, H, W, pad, in_dtype, budget_bytes, num_tc):
    """Images-per-block so the (8,128)-rounded per-step VMEM footprint fits the budget."""
    Hp, Wp = H + 2 * pad, W + 2 * pad
    ib = np.dtype(in_dtype).itemsize
    per_batch = (
        2 * _round_up(H, 8) * _round_up(W, 128) * ib      # input block, double-buffered
        + 2 * _round_up(H, 8) * _round_up(W, 128) * ib    # output block, double-buffered
        + _round_up(H, 8) * _round_up(Wp, 128) * 4        # xp scratch (f32)
        + _round_up(Hp, 8) * _round_up(W, 128) * 4        # tmp scratch (f32)
    )
    bt = max(1, min(N, budget_bytes // max(per_batch, 1)))
    if num_tc >= 2 and N >= 2:
        # Keep >=2 grid steps only on 2-TensorCore chips (v7x) so both cores get work.
        bt = min(bt, pl.cdiv(N, 2))
    return int(max(1, bt))


def dilated_gaussian_filter(x, kernel_size=3, dilation=2, std=2.0, bias=0.1,
                            vertical_in_registers=None):
    """x: (N, 1, H, W) -> (N, 1, H, W), same dtype as input (f32 accumulation in-kernel)."""
    N, C, H, W = x.shape
    assert C == 1, "DilatedGaussianFilter has a single input channel"
    assert kernel_size % 2 == 1, "symmetric 'same' padding only matches odd kernel_size"
    pad = (kernel_size * dilation - dilation) // 2
    Hp, Wp = H + 2 * pad, W + 2 * pad
    g1d = _gkern1d(kernel_size, std)

    vmem_cap = _vmem_capacity_bytes()
    budget_bytes = (vmem_cap * 3) // 8        # ~24 MiB on v7x, ~48 MiB on v5e/v6e
    vmem_limit = (vmem_cap * 3) // 4          # ~48 MiB on v7x, ~96 MiB on v5e/v6e
    num_tc = _num_tensorcores()

    B = _choose_batch_tile(N, H, W, pad, x.dtype, budget_bytes, num_tc)
    grid = (pl.cdiv(N, B),)                   # ragged last tile allowed (images independent)

    # Metadata-only squeeze; keep caller dtype (no extra HBM upcast pass).
    xs = x[:, 0, :, :]

    if vertical_in_registers is None:
        slab_bytes = B * _round_up(Hp, 8) * _round_up(Wp, 128) * 4
        vertical_in_registers = slab_bytes <= 32 * 1024

    if vertical_in_registers:
        kernel = _make_reg_kernel(B, H, W, kernel_size, dilation, pad, g1d, bias)
        scratch_shapes = []
    else:
        kernel = _make_scratch_kernel(B, H, W, kernel_size, dilation, pad, g1d, bias)
        scratch_shapes = [
            pltpu.VMEM((B, H, Wp), jnp.float32),   # W-padded input tile
            pltpu.VMEM((B, Hp, W), jnp.float32),   # H-padded horizontal-pass intermediate
        ]

    out = pl.pallas_call(
        kernel,
        out_shape=jax.ShapeDtypeStruct((N, H, W), x.dtype),
        grid=grid,
        in_specs=[pl.BlockSpec((B, H, W), lambda n: (n, 0, 0))],
        out_specs=pl.BlockSpec((B, H, W), lambda n: (n, 0, 0)),
        scratch_shapes=scratch_shapes,
        compiler_params=pltpu.CompilerParams(
            dimension_semantics=("parallel",),
            vmem_limit_bytes=int(vmem_limit),
        ),
    )(xs)

    return out[:, None, :, :]  # back to NCHW


def _reference(x, kernel_size=3, dilation=2, std=2.0, bias=0.1):
    """Pure-JAX reference using lax.conv_general_dilated (matches nn.Conv2d)."""
    pad = (kernel_size * dilation - dilation) // 2
    w = jnp.asarray(gkern(kernel_size, std))[None, None, :, :]  # OIHW
    y = jax.lax.conv_general_dilated(
        x.astype(jnp.float32), w,
        window_strides=(1, 1),
        padding=[(pad, pad), (pad, pad)],
        rhs_dilation=(dilation, dilation),
        dimension_numbers=("NCHW", "OIHW", "NCHW"),
    )
    return y + jnp.float32(bias)


if __name__ == "__main__":
    key = jax.random.PRNGKey(0)
    N, C, H, W = 2, 1, 16, 16          # Conv2d(1, 1, ...) => single channel
    kernel_size, dilation = 3, 2
    bias = 0.1                          # deterministic stand-in for Conv2d's random bias

    x = jax.random.normal(key, (N, C, H, W), dtype=jnp.float32)
    y_ref = jax.block_until_ready(_reference(x, kernel_size, dilation, 2.0, bias))

    # Path 1: vreg-resident (no-scratch) path, auto-selected for small tiles.
    y = jax.block_until_ready(dilated_gaussian_filter(x, kernel_size, dilation, 2.0, bias))
    assert y.shape == (N, C, H, W)
    np.testing.assert_allclose(np.asarray(y), np.asarray(y_ref), rtol=1e-5, atol=1e-5)

    # Path 2: VMEM-scratch path (used for large tiles) — force it to validate that code path too.
    y2 = jax.block_until_ready(
        dilated_gaussian_filter(x, kernel_size, dilation, 2.0, bias, vertical_in_registers=False))
    np.testing.assert_allclose(np.asarray(y2), np.asarray(y_ref), rtol=1e-5, atol=1e-5)

    print("KERNEL_OK")
</pallas_src>

<mosaic_0001>
module attributes {stable_mosaic.version = 11 : i64} {
  func.func @kernel(%arg0: i32, %arg1: memref<2x16x16xf32, #tpu.memory_space<vmem>>, %arg2: memref<2x16x16xf32, #tpu.memory_space<vmem>>) attributes {dimension_semantics = [#tpu.dimension_semantics<parallel>], iteration_bounds = array<i64: 1>, scalar_prefetch = 0 : i64, scratch_operands = 0 : i64, tpu.core_type = #tpu.core_type<tc>, window_params = [{transform_indices = @transform_0, window_bounds = array<i64: 2, 16, 16>}, {transform_indices = @transform_1, window_bounds = array<i64: 2, 16, 16>}]} {
    %c0 = arith.constant 0 : index
    %c0_0 = arith.constant 0 : index
    %c0_1 = arith.constant 0 : index
    %0 = vector.load %arg1[%c0, %c0_0, %c0_1] : memref<2x16x16xf32, #tpu.memory_space<vmem>>, vector<2x16x16xf32>
    %cst = arith.constant 0.000000e+00 : f32
    %1 = vector.broadcast %cst : f32 to vector<2x16x2xf32>
    %2 = tpu.concatenate %1, %0, %1 in 2 : vector<2x16x2xf32>, vector<2x16x16xf32>, vector<2x16x2xf32> -> vector<2x16x20xf32>
    %3 = vector.extract_strided_slice %2 {offsets = [0, 0, 0], sizes = [2, 16, 16], strides = [1, 1, 1]} : vector<2x16x20xf32> to vector<2x16x16xf32>
    %cst_2 = arith.constant 0.882496893 : f32
    %4 = vector.broadcast %cst_2 : f32 to vector<2x16x16xf32>
    %5 = arith.mulf %4, %3 : vector<2x16x16xf32>
    %6 = vector.extract_strided_slice %2 {offsets = [0, 0, 2], sizes = [2, 16, 16], strides = [1, 1, 1]} : vector<2x16x20xf32> to vector<2x16x16xf32>
    %cst_3 = arith.constant 1.000000e+00 : f32
    %7 = vector.broadcast %cst_3 : f32 to vector<2x16x16xf32>
    %8 = arith.mulf %7, %6 : vector<2x16x16xf32>
    %9 = arith.addf %5, %8 : vector<2x16x16xf32>
    %10 = vector.extract_strided_slice %2 {offsets = [0, 0, 4], sizes = [2, 16, 16], strides = [1, 1, 1]} : vector<2x16x20xf32> to vector<2x16x16xf32>
    %cst_4 = arith.constant 0.882496893 : f32
    %11 = vector.broadcast %cst_4 : f32 to vector<2x16x16xf32>
    %12 = arith.mulf %11, %10 : vector<2x16x16xf32>
    %13 = arith.addf %9, %12 : vector<2x16x16xf32>
    %cst_5 = arith.constant 0.000000e+00 : f32
    %14 = vector.broadcast %cst_5 : f32 to vector<2x2x16xf32>
    %15 = tpu.concatenate %14, %13, %14 in 1 : vector<2x2x16xf32>, vector<2x16x16xf32>, vector<2x2x16xf32> -> vector<2x20x16xf32>
    %16 = vector.extract_strided_slice %15 {offsets = [0, 0, 0], sizes = [2, 16, 16], strides = [1, 1, 1]} : vector<2x20x16xf32> to vector<2x16x16xf32>
    %cst_6 = arith.constant 0.882496893 : f32
    %17 = vector.broadcast %cst_6 : f32 to vector<2x16x16xf32>
    %18 = arith.mulf %17, %16 : vector<2x16x16xf32>
    %19 = vector.extract_strided_slice %15 {offsets = [0, 2, 0], sizes = [2, 16, 16], strides = [1, 1, 1]} : vector<2x20x16xf32> to vector<2x16x16xf32>
    %cst_7 = arith.constant 1.000000e+00 : f32
    %20 = vector.broadcast %cst_7 : f32 to vector<2x16x16xf32>
    %21 = arith.mulf %20, %19 : vector<2x16x16xf32>
    %22 = arith.addf %18, %21 : vector<2x16x16xf32>
    %23 = vector.extract_strided_slice %15 {offsets = [0, 4, 0], sizes = [2, 16, 16], strides = [1, 1, 1]} : vector<2x20x16xf32> to vector<2x16x16xf32>
    %cst_8 = arith.constant 0.882496893 : f32
    %24 = vector.broadcast %cst_8 : f32 to vector<2x16x16xf32>
    %25 = arith.mulf %24, %23 : vector<2x16x16xf32>
    %26 = arith.addf %22, %25 : vector<2x16x16xf32>
    %cst_9 = arith.constant 1.000000e-01 : f32
    %27 = vector.broadcast %cst_9 : f32 to vector<2x16x16xf32>
    %28 = arith.addf %26, %27 : vector<2x16x16xf32>
    %c0_10 = arith.constant 0 : index
    %c0_11 = arith.constant 0 : index
    %c0_12 = arith.constant 0 : index
    %29 = vector.load %arg2[%c0_10, %c0_11, %c0_12] : memref<2x16x16xf32, #tpu.memory_space<vmem>>, vector<2x16x16xf32>
    tpu.vector_store %arg2[%c0_10, %c0_11, %c0_12], %28 {strides = array<i32>} : memref<2x16x16xf32, #tpu.memory_space<vmem>>, vector<2x16x16xf32>,
    return
  }
  func.func @transform_0(%arg0: i32) -> (i32, i32, i32) {
    %c0_i32 = arith.constant 0 : i32
    %c0_i32_0 = arith.constant 0 : i32
    %c0_i32_1 = arith.constant 0 : i32
    return %arg0, %c0_i32, %c0_i32_0 : i32, i32, i32
  }
  func.func @transform_1(%arg0: i32) -> (i32, i32, i32) {
    %c0_i32 = arith.constant 0 : i32
    %c0_i32_0 = arith.constant 0 : i32
    %c0_i32_1 = arith.constant 0 : i32
    return %arg0, %c0_i32, %c0_i32_0 : i32, i32, i32
  }
}

</mosaic_0001>

<bundles_post_ra>
// kernel: tpu_custom_call.1
= control target key start
LH: loop header
LB: loop body
LE: loop exit
PB: predicated region body
PF: predicated region fallthrough
CT: control target
= control target key end

     0   :  { %6 = vsyncpa [#allocation3], 0  ;;  %s322_s0 = inlined_call_operand.hbm [shape: f32[2,16,16], index: 0, kind: input, shape index: {}]   ;;  %s323_s1 = inlined_call_operand.hbm [shape: f32[2,16,16], index: 1, kind: output, shape index: {}]  }
   0x1   :  { %7 = vsyncpa [#allocation4], 0  ;;  %s253_s6 = smov [#allocation2]   ;;  %s205_s10 = scalar_lea.hbm %s322_s0, 512 }
   0x2   :  { %s13_s7 = sshll.u32 %s253_s6, 4  ;;  %p206_p0 = scmp.ne.s32.totalorder %s322_s0, %s205_s10  ;;  %s14_s7 = int_to_ptr.vmem [resolvable:$true] %s13_s7 }
   0x3   :  { %p209_p1 = scmp.lt.u32.totalorder %s205_s10, %s322_s0 }
   0x5   :  { %p211_p2 = pnand %p209_p1, %p206_p0 }
   0x7   :  { %214 = shalt.err (!%p211_p2)
}
   0x8   :  { %s215_s15 = scalar_lea.vmem %s14_s7, 512  ;;  %p220_p4 = scmp.lt.s32.totalorder %s14_s7, %s14_s7 }
   0x9   :  { %p216_p3 = scmp.ne.s32.totalorder %s14_s7, %s215_s15  ;;  %p221_p5 = scmp.lt.s32.totalorder %s215_s15, %s215_s15 }
   0xb   :  { %p222_p6 = por %p221_p5, %p220_p4 }
   0xd   :  { %p223_p7 = pnand %p222_p6, %p216_p3 }
   0xf   :  { %226 = shalt.err (!%p223_p7)
}
  0x10   :  { %s254_s16 = smov 128   ;;  %s255_s17 = smov 8  }
  0x11   :  { %19 = dma.hbm_to_vmem [thread:$0]  %s322_s0, 512, %s14_s7, [#allocation3], %s254_s16, %s254_s16, %s255_s17  }
  0x12   :  { %249 = dma.done.wait [#allocation3], 512  }
  0x13   :  { %250 = vsyncadd [#allocation3], 4294966784  ;;  %v23_v0 = vld [vmem:[#allocation2] sm:$0xff]  ;;  %v25_v1 = vld [vmem:[#allocation2 + $0x10] sm:$0xff]  ;;  %s256_s20 = smov 2   ;;  %vm43_vm0 = vcmask 15360  }
  0x14   :  { %31 = vrot.lane.b32.xlu0 %v23_v0, %s256_s20  ;;  %35 = vrot.lane.b32.xlu1 %v25_v1, %s256_s20  ;;  %v24_v2 = vld [vmem:[#allocation2 + $0x8] sm:$0xff]  ;;  %v26_v3 = vld [vmem:[#allocation2 + $0x18] sm:$0xff]  ;;  %vm48_vm1 = vcmask 146432   ;;  %s257_s0 = smov 126   ;;  %s258_s21 = smov 124   ;;  %vm101_vm2 = vcmask 1041408  }
  0x15   :  { %vm126_vm3 = vcmask 1045504   ;;  %vm153_vm4 = vcmask 1043456   ;;  %vm176_vm5 = vcmask 130048   ;;  %s259_s22 = smov [#allocation5]  }
  0x16   :  { %s186_s23 = sshll.u32 %s259_s22, 4  ;;  %s187_s23 = int_to_ptr.vmem [resolvable:$true] %s186_s23 }
  0x17   :  { %s227_s24 = scalar_lea.vmem %s187_s23, 512  ;;  %p232_p9 = scmp.lt.s32.totalorder %s187_s23, %s187_s23 }
  0x18   :  { %33 = vrot.lane.b32.xlu0 %v24_v2, %s256_s20  ;;  %37 = vrot.lane.b32.xlu1 %v26_v3, %s256_s20  ;;  %p228_p8 = scmp.ne.s32.totalorder %s187_s23, %s227_s24  ;;  %p233_p10 = scmp.lt.s32.totalorder %s227_s24, %s227_s24 }
  0x1a   :  { %p234_p11 = por %p233_p10, %p232_p9 }
  0x1c   :  { %p235_p12 = pnand %p234_p11, %p228_p8 }
  0x86   :  { %v32_v4 = vpop.permute.xlu0 %31  ;;  %v36_v5 = vpop.permute.xlu1 %35 }
  0x87   :  { %v44_v6 = vsel %vm43_vm0, 0.0, %v32_v4  ;;  %v46_v7 = vsel %vm43_vm0, 0.0, %v36_v5 }
  0x88   :  { %v49_v8 = vsel %vm48_vm1, %v44_v6, 0.0  ;;  %v51_v9 = vsel %vm48_vm1, %v46_v7, 0.0 }
  0x89   :  { %61 = vrot.lane.b32.xlu0 %v49_v8, %s257_s0  ;;  %v53_v16 = vmul.f32 0.8824969, %v49_v8  ;;  %v55_v17 = vmul.f32 0.8824969, %v51_v9 }
  0x8a   :  { %v34_v10 = vpop.permute.xlu0 %33  ;;  %v38_v11 = vpop.permute.xlu1 %37 }
  0x8b   :  { %v45_v12 = vsel %vm43_vm0, 0.0, %v34_v10  ;;  %v47_v13 = vsel %vm43_vm0, 0.0, %v38_v11 }
  0x8c   :  { %v50_v14 = vsel %vm48_vm1, %v45_v12, 0.0  ;;  %v52_v15 = vsel %vm48_vm1, %v47_v13, 0.0 }
  0x8d   :  { %65 = vrot.lane.b32.xlu0 %v51_v9, %s257_s0  ;;  %63 = vrot.lane.b32.xlu1 %v50_v14, %s257_s0  ;;  %v54_v18 = vmul.f32 0.8824969, %v50_v14  ;;  %v56_v19 = vmul.f32 0.8824969, %v52_v15 }
  0x91   :  { %81 = vrot.lane.b32.xlu0 %v53_v16, %s258_s21  ;;  %67 = vrot.lane.b32.xlu1 %v52_v15, %s257_s0 }
  0x95   :  { %85 = vrot.lane.b32.xlu0 %v55_v17, %s258_s21  ;;  %83 = vrot.lane.b32.xlu1 %v54_v18, %s258_s21 }
  0x99   :  { %87 = vrot.lane.b32.xlu1 %v56_v19, %s258_s21 }
  0xfb   :  { %v62_v20 = vpop.permute.xlu0 %61 }
  0xfc   :  { %v73_v23 = vadd.f32 %v62_v20, %v53_v16 }
  0xff   :  { %v64_v21 = vpop.permute.xlu1 %63  ;;  %v66_v22 = vpop.permute.xlu0 %65 }
 0x100   :  { %v74_v27 = vadd.f32 %v64_v21, %v54_v18  ;;  %v75_v28 = vadd.f32 %v66_v22, %v55_v17 }
 0x103   :  { %v68_v24 = vpop.permute.xlu1 %67  ;;  %v82_v25 = vpop.permute.xlu0 %81 }
 0x104   :  { %v93_v26 = vadd.f32 %v82_v25, %v73_v23  ;;  %v76_v35 = vadd.f32 %v68_v24, %v56_v19 }
 0x106   :  { %v102_v29 = vrot.slane %v93_v26, 6 }
 0x107   :  { %v84_v30 = vpop.permute.xlu1 %83  ;;  %v86_v31 = vpop.permute.xlu0 %85 }
 0x108   :  { %v114_v32 = vsel %vm101_vm2, 0.0, %v102_v29  ;;  %v94_v33 = vadd.f32 %v84_v30, %v74_v27  ;;  %v95_v34 = vadd.f32 %v86_v31, %v75_v28 }
 0x109   :  { %v118_v36 = vmul.f32 0.8824969, %v114_v32  ;;  %v127_v39 = vrot.slane %v114_v32, 2 }
 0x10a   :  { %v103_v37 = vrot.slane %v94_v33, 6  ;;  %v105_v38 = vrot.slane %v95_v34, 6 }
 0x10b   :  { %v88_v40 = vpop.permute.xlu1 %87  ;;  %v154_v49 = vrot.slane %v118_v36, 4 }
 0x10c   :  { %v104_v41 = vsel %vm101_vm2, %v102_v29, %v103_v37  ;;  %v116_v42 = vsel %vm101_vm2, %v103_v37, 0.0  ;;  %v115_v43 = vsel %vm101_vm2, 0.0, %v105_v38  ;;  %v96_v44 = vadd.f32 %v88_v40, %v76_v35 }
 0x10d   :  { %v119_v45 = vmul.f32 0.8824969, %v104_v41  ;;  %v128_v46 = vrot.slane %v104_v41, 2  ;;  %v130_v47 = vrot.slane %v116_v42, 2  ;;  %v145_v48 = vmul.f32 0.8824969, %v116_v42 }
 0x10e   :  { %v120_v50 = vmul.f32 0.8824969, %v115_v43  ;;  %v106_v51 = vrot.slane %v96_v44, 6  ;;  %v132_v58 = vrot.slane %v115_v43, 2 }
 0x10f   :  { %v129_v52 = vsel %vm126_vm3, %v127_v39, %v128_v46  ;;  %v131_v53 = vsel %vm126_vm3, %v128_v46, %v130_v47  ;;  %v155_v54 = vrot.slane %v119_v45, 4  ;;  %v157_v55 = vrot.slane %v145_v48, 4 }
 0x110   :  { %v141_v56 = vadd.f32 %v129_v52, %v118_v36  ;;  %v142_v57 = vadd.f32 %v131_v53, %v119_v45  ;;  %v107_v59 = vsel %vm101_vm2, %v105_v38, %v106_v51  ;;  %v117_v62 = vsel %vm101_vm2, %v106_v51, 0.0 }
 0x111   :  { %v156_v60 = vsel %vm153_vm4, %v154_v49, %v155_v54  ;;  %v158_v61 = vsel %vm153_vm4, %v155_v54, %v157_v55  ;;  %v121_v63 = vmul.f32 0.8824969, %v107_v59  ;;  %v133_v1 = vrot.slane %v107_v59, 2 }
 0x112   :  { %v169_v0 = vadd.f32 %v158_v61, %v142_v57  ;;  %v135_v2 = vrot.slane %v117_v62, 2  ;;  %v146_v3 = vmul.f32 0.8824969, %v117_v62  ;;  %v159_v4 = vrot.slane %v120_v50, 4 }
 0x113   :  { %v160_v5 = vrot.slane %v121_v63, 4  ;;  %v168_v6 = vadd.f32 %v156_v60, %v141_v56  ;;  %v134_v8 = vsel %vm126_vm3, %v132_v58, %v133_v1 }
 0x114   :  { %v173_v7 = vadd.f32 0.1, %v169_v0  ;;  %v136_v9 = vsel %vm126_vm3, %v133_v1, %v135_v2  ;;  %v162_v10 = vrot.slane %v146_v3, 4  ;;  %v143_v11 = vadd.f32 %v134_v8, %v120_v50 }
 0x115   :  { %v144_v12 = vadd.f32 %v136_v9, %v121_v63  ;;  %v161_v13 = vsel %vm153_vm4, %v159_v4, %v160_v5  ;;  %v172_v14 = vadd.f32 0.1, %v168_v6 }
 0x116   :  { %v163_v15 = vsel %vm153_vm4, %v160_v5, %v162_v10  ;;  %178 = vst.msk [vmem:[#allocation5 + $0x8] sm:$0xff] %vm176_vm5, %v173_v7  ;;  %v170_v17 = vadd.f32 %v161_v13, %v143_v11 }
 0x117   :  { %v171_v16 = vadd.f32 %v163_v15, %v144_v12  ;;  %177 = vst.msk [vmem:[#allocation5] sm:$0xff] %vm176_vm5, %v172_v14 }
 0x118   :  { %v174_v19 = vadd.f32 0.1, %v170_v17 }
 0x119   :  { %v175_v18 = vadd.f32 0.1, %v171_v16 }
 0x11a   :  { %179 = vst.msk [vmem:[#allocation5 + $0x10] sm:$0xff] %vm176_vm5, %v174_v19 }
 0x11b   :  { %180 = vst.msk [vmem:[#allocation5 + $0x18] sm:$0xff] %vm176_vm5, %v175_v18 }
 0x11c   :  { %238 = shalt.err (!%p235_p12)
}
 0x11d   :  { %s239_s27 = scalar_lea.hbm %s323_s1, 512 }
 0x11e   :  { %p240_p13 = scmp.ne.s32.totalorder %s323_s1, %s239_s27  ;;  %p243_p0 = scmp.lt.u32.totalorder %s239_s27, %s323_s1 }
 0x120   :  { %p245_p1 = pnand %p243_p0, %p240_p13 }
 0x122   :  { %248 = shalt.err (!%p245_p1)
}
 0x123   :  { %192 = dma.vmem_to_hbm [thread:$0]  %s187_s23, 512, %s323_s1, [#allocation4], %s254_s16, %s254_s16, %s255_s17  }
 0x124   :  { %251 = dma.done.wait [#allocation4], 512  }
 0x125   :  { %252 = vsyncadd [#allocation4], 4294966784 }
 0x126   :  { %196 = vsyncpa [#allocation3], 1 }
 0x127   :  { %197 = vsyncpa [#allocation4], 1 }

</bundles_post_ra>
